<compile_context>
chip_gen: v7x
topology: tpu7x:2x2x1
jax: 0.10.0
libtpu: 0.0.40
codegen_flags: <defaults>
</compile_context>

<pallas_src>
import math

import jax
import jax.numpy as jnp
from jax.experimental import pallas as pl
from jax.experimental.pallas import tpu as pltpu

LANE = 128           # vreg lane width (last-dim tiling unit)
ROW_ALIGN = 32       # row-block alignment: keeps bf16 (16,128)/int8 (32,128) packing happy
# Bytes of full-size-operand + output traffic per grid step.  Double-buffered
# by the Pallas pipeline this is ~12 MiB of VMEM: under v5e's 16 MiB scoped
# default and comfortably under v6e/v7x's 32 MiB, while putting >=4 MiB of HBM
# traffic behind every ~0.35 us of per-step overhead.
_TOTAL_BLOCK_BYTES = 6 << 20


def _round_up(x, m):
    return (x + m - 1) // m * m


def _mul_kernel(a_ref, b_ref, o_ref):
    # Mixed input dtypes are cast on-vreg (the VPU has huge slack in this
    # HBM-bound kernel); the wrapper never casts the big operands in HBM.
    o = o_ref.dtype
    o_ref[...] = a_ref[...].astype(o) * b_ref[...].astype(o)


def _block_rc(R, C, bytes_per_elem):
    """Pick a (block_r, block_c) tile of an (R, C) output for elementwise work.

    bytes_per_elem = summed itemsizes of every full-size operand plus the
    output, so block_r * block_c * bytes_per_elem <= _TOTAL_BLOCK_BYTES.
    """
    budget = max(8 * LANE, _TOTAL_BLOCK_BYTES // bytes_per_elem)

    # Lane block: take the whole last dim whenever it fits alongside a few
    # rows (longest contiguous DMA runs, maximally lane-dense stores);
    # otherwise the largest 128-multiple that fits (ragged tail is masked).
    rmin = min(R, ROW_ALIGN)
    if C * rmin <= budget:
        block_c = C
    else:
        block_c = max(LANE, min(C, budget // rmin) // LANE * LANE)

    # Row block: 32-aligned, sized to the remaining budget.
    target_r = max(ROW_ALIGN, (budget // block_c) // ROW_ALIGN * ROW_ALIGN)
    block_r = R if R <= target_r else target_r

    # If a single block would cover a large array, split it so both v7x
    # TensorCores get work under the "parallel" grid semantics.
    if (block_r == R and block_c == C and R > 2 * ROW_ALIGN
            and R * C * bytes_per_elem > (2 << 20)):
        block_r = _round_up(pl.cdiv(R, 2), ROW_ALIGN)

    return block_r, block_c


def _pallas_mul_bcast(a, b, out_shape, out_dtype):
    """Elementwise a*b where every dim of a/b is 1 (broadcast) or full extent.

    Broadcast dims are never materialized in HBM: their block size is 1 and
    the index_map pins block index 0, so expansion happens on-vreg.
    """
    rank = len(out_shape)
    R, C = out_shape[-2], out_shape[-1]

    bpe = jnp.dtype(out_dtype).itemsize
    for x in (a, b):
        if x.shape[-2] == R and x.shape[-1] == C:
            bpe += x.dtype.itemsize
    block_r, block_c = _block_rc(R, C, bpe)

    grid = tuple(int(d) for d in out_shape[:-2]) + (
        pl.cdiv(R, block_r), pl.cdiv(C, block_c))

    def make_spec(shape):
        bcast = tuple(shape[d] == 1 and out_shape[d] != 1 for d in range(rank))
        bshape = (1,) * (rank - 2) + (
            block_r if shape[-2] == R else 1,
            block_c if shape[-1] == C else 1)

        def imap(*idx, _bcast=bcast):
            return tuple(0 if f else i for f, i in zip(_bcast, idx))

        return pl.BlockSpec(bshape, imap)

    out_spec = pl.BlockSpec((1,) * (rank - 2) + (block_r, block_c),
                            lambda *idx: idx)

    return pl.pallas_call(
        _mul_kernel,
        out_shape=jax.ShapeDtypeStruct(tuple(out_shape), out_dtype),
        grid=grid,
        in_specs=[make_spec(a.shape), make_spec(b.shape)],
        out_specs=out_spec,
        compiler_params=pltpu.CompilerParams(
            dimension_semantics=("parallel",) * len(grid)),
    )(a, b)


def _pallas_mul_1d(a1, b1, n, out_dtype):
    """Flat multiply when n is not a multiple of 128: run directly on the 1-D
    arrays (ragged final block is masked) instead of a padded HBM copy."""
    bpe = jnp.dtype(out_dtype).itemsize
    for x in (a1, b1):
        if x.size == n:
            bpe += x.dtype.itemsize
    budget = max(LANE, _TOTAL_BLOCK_BYTES // bpe)
    if n <= budget:
        block = n                                   # single full-dim block
    else:
        block = max(LANE, (budget // LANE) * LANE)  # 128-multiple, ragged tail

    def spec(x):
        if x.size == n:
            return pl.BlockSpec((block,), lambda i: (i,))
        return pl.BlockSpec((1,), lambda i: (0,))

    return pl.pallas_call(
        _mul_kernel,
        out_shape=jax.ShapeDtypeStruct((n,), out_dtype),
        grid=(pl.cdiv(n, block),),
        in_specs=[spec(a1), spec(b1)],
        out_specs=pl.BlockSpec((block,), lambda i: (i,)),
        compiler_params=pltpu.CompilerParams(
            dimension_semantics=("parallel",)),
    )(a1, b1)


def _mul_flat(a1, b1, n, out_dtype):
    """Flat multiply of 1-D operands of size n (full) or 1 (scalar)."""
    if n % LANE == 0:
        w = 512 if n % 512 == 0 else (256 if n % 256 == 0 else LANE)
        rows = n // w

        def to2d(x):
            return x.reshape(rows, w) if x.size == n else x.reshape(1, 1)

        return _pallas_mul_bcast(to2d(a1), to2d(b1), (rows, w), out_dtype)
    return _pallas_mul_1d(a1, b1, n, out_dtype)


def torch_mul(input, other):
    """Semantics of torch.mul / `a * b`: broadcasting + dtype promotion."""
    a = jnp.asarray(input)
    b = jnp.asarray(other)
    out_shape = tuple(int(d) for d in jnp.broadcast_shapes(a.shape, b.shape))
    # TODO(synk): jnp.result_type does not exactly mirror torch's weak-scalar
    # promotion rules for Python scalars (e.g. int tensor * python float).
    out_dtype = jnp.result_type(a, b)

    n = math.prod(out_shape)
    if n == 0:
        return jnp.zeros(out_shape, out_dtype)

    # Tiny operands are cast in the wrapper (cost ~0, also strips weak types);
    # large operands are cast on-vreg in the kernel, never via an extra HBM pass.
    if a.dtype != out_dtype and a.size <= 4096:
        a = a.astype(out_dtype)
    if b.dtype != out_dtype and b.size <= 4096:
        b = b.astype(out_dtype)

    rank = len(out_shape)
    a_s = (1,) * (rank - a.ndim) + tuple(a.shape)
    b_s = (1,) * (rank - b.ndim) + tuple(b.shape)

    # Collapse consecutive dims sharing the same broadcast pattern so the
    # kernel sees the fewest / largest axes (broadcasts stay tiny in HBM).
    groups = []   # [out_dim, a_dim, b_dim, pattern]
    for o, ad, bd in zip(out_shape, a_s, b_s):
        if o == 1:
            continue
        pat = (ad == 1, bd == 1)
        if groups and groups[-1][3] == pat:
            groups[-1][0] *= o
            groups[-1][1] *= ad
            groups[-1][2] *= bd
        else:
            groups.append([o, ad, bd, pat])
    c_out = tuple(g[0] for g in groups)
    c_a = tuple(g[1] for g in groups)
    c_b = tuple(g[2] for g in groups)

    if len(c_out) == 0:     # 1-element output
        out = _pallas_mul_bcast(a.reshape(1, 1), b.reshape(1, 1), (1, 1),
                                out_dtype)
        return out.reshape(out_shape)

    av = a.reshape(c_a)
    bv = b.reshape(c_b)

    if len(c_out) == 1:
        return _mul_flat(av, bv, c_out[0], out_dtype).reshape(out_shape)

    # Degenerate-tiling safety valve: if the trailing collapsed dims are tiny
    # but the leading grid would be huge, per-step overhead dominates and a
    # materialized flat multiply is cheaper (rare shapes only).
    leading = math.prod(c_out[:-2])
    if leading > 256 and c_out[-2] * c_out[-1] < 32 * LANE:
        a1 = jnp.broadcast_to(av, c_out).reshape(-1)
        b1 = jnp.broadcast_to(bv, c_out).reshape(-1)
        return _mul_flat(a1, b1, n, out_dtype).reshape(out_shape)

    return _pallas_mul_bcast(av, bv, c_out, out_dtype).reshape(out_shape)


if __name__ == "__main__":
    key = jax.random.PRNGKey(0)
    k1, k2, k3, k4 = jax.random.split(key, 4)

    # 1) NCHW tensor x per-channel scale (broadcast over batch & spatial).
    x = jax.random.normal(k1, (2, 4, 16, 16), dtype=jnp.float32)
    s = jax.random.normal(k2, (1, 4, 1, 1), dtype=jnp.float32)
    out = torch_mul(x, s)
    jax.block_until_ready(out)
    ref = x * s
    assert out.shape == ref.shape and out.dtype == ref.dtype
    assert jnp.allclose(out, ref, atol=1e-6, rtol=1e-6)

    # 2) Same-shape elementwise multiply (flat lane-dense slab path).
    y = jax.random.normal(k3, (2, 4, 16, 16), dtype=jnp.float32)
    out2 = torch_mul(x, y)
    jax.block_until_ready(out2)
    assert jnp.allclose(out2, x * y, atol=1e-6, rtol=1e-6)

    # 3) Mixed dtype: bf16 tensor x python float scalar (in-kernel cast path).
    xb = x.astype(jnp.bfloat16)
    out3 = torch_mul(xb, 2.5)
    jax.block_until_ready(out3)
    ref3 = xb * 2.5
    assert out3.shape == ref3.shape and out3.dtype == ref3.dtype
    assert jnp.allclose(out3.astype(jnp.float32), ref3.astype(jnp.float32),
                        atol=1e-2, rtol=1e-2)

    # 4) Two-sided broadcasting (2,1,32) x (1,4,32) without materialization.
    u = jax.random.normal(k4, (2, 1, 32), dtype=jnp.float32)
    v = jax.random.normal(k2, (1, 4, 32), dtype=jnp.float32)
    out4 = torch_mul(u, v)
    jax.block_until_ready(out4)
    assert out4.shape == (2, 4, 32)
    assert jnp.allclose(out4, u * v, atol=1e-6, rtol=1e-6)

    print("KERNEL_OK")
</pallas_src>

<mosaic_0001>
module attributes {stable_mosaic.version = 11 : i64} {
  func.func @_mul_kernel(%arg0: i32, %arg1: i32, %arg2: i32, %arg3: memref<1x4x256xf32, #tpu.memory_space<vmem>>, %arg4: memref<1x4x1xf32, #tpu.memory_space<vmem>>, %arg5: memref<1x4x256xf32, #tpu.memory_space<vmem>>) attributes {dimension_semantics = [#tpu.dimension_semantics<parallel>, #tpu.dimension_semantics<parallel>, #tpu.dimension_semantics<parallel>], iteration_bounds = array<i64: 2, 1, 1>, scalar_prefetch = 0 : i64, scratch_operands = 0 : i64, tpu.core_type = #tpu.core_type<tc>, window_params = [{transform_indices = @transform_0, window_bounds = array<i64: 1, 4, 256>}, {transform_indices = @transform_1, window_bounds = array<i64: 1, 4, 1>}, {transform_indices = @transform_2, window_bounds = array<i64: 1, 4, 256>}]} {
    %c0 = arith.constant 0 : index
    %c0_0 = arith.constant 0 : index
    %c0_1 = arith.constant 0 : index
    %0 = vector.load %arg3[%c0, %c0_0, %c0_1] : memref<1x4x256xf32, #tpu.memory_space<vmem>>, vector<1x4x256xf32>
    %c0_2 = arith.constant 0 : index
    %c0_3 = arith.constant 0 : index
    %c0_4 = arith.constant 0 : index
    %1 = vector.load %arg4[%c0_2, %c0_3, %c0_4] : memref<1x4x1xf32, #tpu.memory_space<vmem>>, vector<1x4x1xf32>
    %2 = vector.broadcast %1 : vector<1x4x1xf32> to vector<1x4x256xf32>
    %3 = arith.mulf %0, %2 : vector<1x4x256xf32>
    %c0_5 = arith.constant 0 : index
    %c0_6 = arith.constant 0 : index
    %c0_7 = arith.constant 0 : index
    %4 = vector.load %arg5[%c0_5, %c0_6, %c0_7] : memref<1x4x256xf32, #tpu.memory_space<vmem>>, vector<1x4x256xf32>
    tpu.vector_store %arg5[%c0_5, %c0_6, %c0_7], %3 {strides = array<i32>} : memref<1x4x256xf32, #tpu.memory_space<vmem>>, vector<1x4x256xf32>,
    return
  }
  func.func @transform_0(%arg0: i32, %arg1: i32, %arg2: i32) -> (i32, i32, i32) {
    %c0_i32 = arith.constant 0 : i32
    return %arg0, %arg1, %arg2 : i32, i32, i32
  }
  func.func @transform_1(%arg0: i32, %arg1: i32, %arg2: i32) -> (i32, i32, i32) {
    %c0_i32 = arith.constant 0 : i32
    %c0_i32_0 = arith.constant 0 : i32
    %c0_i32_1 = arith.constant 0 : i32
    return %c0_i32, %arg1, %c0_i32_0 : i32, i32, i32
  }
  func.func @transform_2(%arg0: i32, %arg1: i32, %arg2: i32) -> (i32, i32, i32) {
    %c0_i32 = arith.constant 0 : i32
    return %arg0, %arg1, %arg2 : i32, i32, i32
  }
}

</mosaic_0001>

<bundles_post_ra>
// kernel: tpu_custom_call.1
= control target key start
LH: loop header
LB: loop body
LE: loop exit
PB: predicated region body
PF: predicated region fallthrough
CT: control target
= control target key end

     0   :  { %7 = vsyncpa [#allocation3], 0  ;;  %s742_s0 = inlined_call_operand.hbm [shape: f32[2,4,256], index: 0, kind: input, shape index: {}]   ;;  %s743_s1 = inlined_call_operand.vmem [shape: f32[1,4,1], index: 1, kind: input, shape index: {}]   ;;  %s744_s2 = inlined_call_operand.hbm [shape: f32[2,4,256], index: 2, kind: output, shape index: {}]  }
   0x1   :  { %9 = vsyncpa [#allocation3 + $0x1], 0 }
   0x2   :  { %10 = vsyncpa [#allocation4], 0 }
   0x3   :  { %12 = vsyncpa [#allocation4 + $0x1], 0  ;;  %s567_s9 = smov 0   ;;  %s569_s10 = smov 0  }
   0x4   :  { %s571_s11 = smov 0   ;;  %s573_s12 = smov 0  }
   0x5   :  { %s575_s13 = smov 0   ;;  %s577_s14 = smov 0  }
   0x6 LB: > { %s351_s15 = sadd.s32 4294967295, %s546_s14   ;;  %s352_s16 = sadd.s32 4294967294, %s546_s14   ;;  %s546_s14 = sphi %s577_s14, %s18_s14   ;;  %s542_s13 = sphi %s575_s13, %s760_s13   ;;  %s538_s12 = sphi %s573_s12, %s759_s12   ;;  %s534_s11 = sphi %s571_s11, %s758_s11   ;;  %s530_s10 = sphi %s569_s10, %s757_s10   ;;  %s526_s9 = sphi %s567_s9, %s756_s9  }
   0x7   : > { %s37_s17 = sadd.s32 1, %s542_s13  ;;  %s48_s18 = sadd.s32 1, %s534_s11 }
   0x8   : > { %p39_p0 = scmp.ge.s32.totalorder %s37_s17, 2  ;;  %p55_p1 = scmp.ne.s32.totalorder %s534_s11, %s530_s10 }
   0x9   : > { %p56_p2 = scmp.eq.s32.totalorder %s546_s14, 0  ;;  %p61_p3 = scmp.ne.s32.totalorder %s530_s10, %s526_s9 }
   0xa   : > { %s762_s17 = smov (%p39_p0, %s37_s17), 0  ;;  %p62_p5 = scmp.eq.s32.totalorder %s351_s15, 0 }
   0xb   : > { %p608_p4 = por %p56_p2, %p55_p1  ;;  %s41_s20 = ssub.s32 %s542_s13, %s762_s17 }
   0xc   : > { %p115_p6 = scmp.eq.s32.totalorder %s351_s15, 1  ;;  %p46_p7 = scmp.eq.s32.totalorder %s41_s20, 0 }
   0xd   : > { %p614_p8 = por %p62_p5, %p61_p3  ;;  %p121_p10 = scmp.eq.s32.totalorder %s352_s16, 1 }
   0xe   : > { %p618_p9 = por %p115_p6, %p55_p1  ;;  %p381_p13 = scmp.lt.s32.totalorder %s546_s14, 2 }
   0xf   : > { %s623_s23 = scalar_select %p46_p7, %s534_s11, %s48_s18  }
  0x10   : > { %s748_s22 = scalar_select %p618_p9, 1, 0 }
  0x11   : > { %p625_p11 = por %p121_p10, %p61_p3  ;;  %s148_s25 = sand.u32 1, %s534_s11  }
  0x12   : > { %s356_s26 = sshll.u32 %s148_s25, 3  ;;  %s367_s27 = sshll.u32 %s542_s13, 7 }
  0x13   : > { %s749_s24 = scalar_select %p625_p11, 1, 0 }
  0x14   : > { %s636_s30 = scalar_lea.hbm %s742_s0, %s367_s27  ;;  %s152_s3 = scalar_lea.vmem [#allocation2], %s356_s26 }
  0x15   : > { %s164_s4 = sshll.u32 %s152_s3, 4  ;;  %p642_p0 = pnand %p381_p13, %p608_p4  ;;  %s638_s4 = int_to_ptr.vmem [resolvable:$true] %s164_s4 }
  0x16   : > { %s149_s6 = scalar_lea.sflag [#allocation3], %s148_s25  ;;  %s434_s7 = scalar_lea.hbm %s636_s30, 128 }
  0x17   : > { %p435_p3 = scmp.ne.s32.totalorder %s636_s30, %s434_s7  ;;  %p436_p5 = pneg %p642_p0 }
  0x18   : > { %s439_s16 = scalar_lea.hbm %s742_s0, 256  ;;  %p440_p4 = scmp.lt.u32.totalorder %s636_s30, %s742_s0 }
  0x19   : > { %p437_p6 = pnand %p436_p5, %p435_p3  ;;  %p441_p10 = scmp.lt.u32.totalorder %s439_s16, %s434_s7 }
  0x1a   : > { %p443_p12 = scmp.lt.u32.totalorder %s434_s7, %s636_s30 }
  0x1b   : > { %p438_p7 = pneg %p437_p6  ;;  %p442_p13 = por %p441_p10, %p440_p4 }
  0x1d   : > { %p444_p1 = por %p443_p12, %p442_p13 }
  0x1f   : > { %p445_p2 = pnand %p444_p1, %p438_p7 }
  0x21   : > { %448 = shalt.err (!%p445_p2)
}
  0x22   : > { %s449_s20 = scalar_lea.vmem %s638_s4, 128  ;;  %s548_s25 = smov [#allocation2]  }
  0x23   : > { %p450_p3 = scmp.ne.s32.totalorder %s638_s4, %s449_s20  ;;  %s454_s26 = sshll.u32 %s548_s25, 4  ;;  %s455_s26 = int_to_ptr.vmem [resolvable:$false] %s454_s26 }
  0x24   : > { %s456_s27 = scalar_lea.vmem %s455_s26, 256  ;;  %p457_p9 = scmp.lt.s32.totalorder %s638_s4, %s455_s26 }
  0x25   : > { %p452_p6 = pnand %p450_p3, %p436_p5  ;;  %p458_p4 = scmp.lt.s32.totalorder %s456_s27, %s449_s20 }
  0x27   : > { %p453_p11 = pneg %p452_p6  ;;  %p459_p10 = por %p458_p4, %p457_p9 }
  0x29   : > { %p460_p12 = pnand %p459_p10, %p453_p11 }
  0x2b   : > { %463 = shalt.err (!%p460_p12)
}
  0x2c   : > { %376 = dma.hbm_to_vmem [thread:$0]  (!%p642_p0), %s636_s30, 128, %s638_s4, %s149_s6  }
  0x2d   : > { %p751_p1 = scmp.lt.s32.totalorder %s546_s14, 3  ;;  %p752_p2 = scmp.ge.s32.totalorder %s546_s14, 1 }
  0x2f   : > { %p170_p5 = pnand %p752_p2, %p751_p1 }
  0x30   : > { %s678_s28 = sand.u32 (!%p170_p5), 1, %s530_s10  }
  0x31   : > { %173 = sbr.rel (%p170_p5) target bundleno = 205 (0xcd), region = 28  ;;  %s360_s29 = sshll.u32 (!%p170_p5), %s678_s28, 3 }
  0x32   : > { %s176_s3 = scalar_lea.sflag (!%p170_p5), [#allocation3], %s678_s28  ;;  %s179_s7 = scalar_lea.vmem (!%p170_p5), [#allocation2], %s360_s29 }
  0x38   : > { %517 = dma.done.wait (%p614_p8), %s176_s3, 128  }
  0x39   : > { %519 = vsyncadd (%p614_p8), %s176_s3, 4294967168  ;;  %v549_v0 = vmov 0   ;;  %v211_v1 = vld [vmem:[%s743_s1] sm:$0xf]  ;;  %v550_v2 = vmov 839922192   ;;  %v219_v4 = vlaneseq }
  0x3a   : > { %433 = vset.pattern.permute.xlu0 %v549_v0  ;;  %v217_v3 = vunpack.c.l.s4 %v550_v2  ;;  %v210_v9 = vld [vmem:[%s179_s7] sm:$0xff]  ;;  %s368_s21 = sshll.u32 %s538_s12, 7  ;;  %s203_s5 = scalar_lea.vmem [#allocation5], %s360_s29 }
  0x3b   : > { %214 = vperm.xlu0 %433, %v211_v1   ;;  %v220_v6 = vshrl.u32 %v219_v4, 7  ;;  %s245_s6 = sshll.u32 %s203_s5, 4  ;;  %s693_s16 = scalar_lea.hbm %s744_s2, %s368_s21  ;;  %s695_s6 = int_to_ptr.vmem [resolvable:$true] %s245_s6 }
  0x3c   : > { %v218_v5 = vunpack.c.0.s8 %v217_v3  ;;  %s227_s18 = scalar_lea.sflag [#allocation4], %s678_s28  ;;  %s464_s19 = scalar_lea.vmem %s695_s6, 128 }
  0x3d   : > { %p465_p8 = scmp.ne.s32.totalorder %s695_s6, %s464_s19  ;;  %p753_p9 = scmp.ne.s32.totalorder %s748_s22, 0 }
  0x3e   : > { %v221_v7 = vsub.s32 %v218_v5, %v220_v6  ;;  %s551_s12 = smov [#allocation5]  }
  0x3f   : > { %p466_p11 = pnand %p465_p8, %p753_p9  ;;  %s468_s20 = sshll.u32 %s551_s12, 4  ;;  %s469_s20 = int_to_ptr.vmem [resolvable:$false] %s468_s20 }
  0x40   : > { %s470_s25 = scalar_lea.vmem %s469_s20, 256  ;;  %p471_p7 = scmp.lt.s32.totalorder %s695_s6, %s469_s20 }
  0x41   : > { %p467_p0 = pneg %p466_p11  ;;  %p472_p13 = scmp.lt.s32.totalorder %s470_s25, %s464_s19 }
  0x43   : > { %p473_p3 = por %p472_p13, %p471_p7 }
  0x45   : > { %p474_p6 = pnand %p473_p3, %p467_p0 }
  0xba   : > { %v215_v8 = vpop.permute.xlu0 %214 }
  0xbb   : > { %v222_v10 = vrot.slane %v215_v8, %v221_v7 }
  0xbd   : > { %v224_v11 = vmul.f32 %v222_v10, %v210_v9 }
  0xbf   : > { %225 = vst [vmem:[%s203_s5] sm:$0xff] %v224_v11 }
  0xc0   : > { %477 = shalt.err (!%p474_p6)
}
  0xc1   : > { %s478_s26 = scalar_lea.hbm %s693_s16, 128  ;;  %s482_s29 = scalar_lea.hbm %s744_s2, 256 }
  0xc2   : > { %p479_p4 = scmp.ne.s32.totalorder %s693_s16, %s478_s26  ;;  %p483_p1 = scmp.lt.u32.totalorder %s693_s16, %s744_s2 }
  0xc3   : > { %p484_p2 = scmp.lt.u32.totalorder %s482_s29, %s478_s26  ;;  %p486_p8 = scmp.lt.u32.totalorder %s478_s26, %s693_s16 }
  0xc4   : > { %p480_p10 = pnand %p479_p4, %p753_p9 }
  0xc5   : > { %p485_p5 = por %p484_p2, %p483_p1 }
  0xc6   : > { %p481_p12 = pneg %p480_p10 }
  0xc7   : > { %p487_p11 = por %p486_p8, %p485_p5 }
  0xc9   : > { %p488_p0 = pnand %p487_p11, %p481_p12 }
  0xcb   : > { %491 = shalt.err (!%p488_p0)
}
  0xcc   : > { %371 = dma.vmem_to_hbm [thread:$0]  (%p753_p9), %s695_s6, 128, %s693_s16, %s227_s18  }
  0xcd PF: > { %s257_s30 = sand.u32 1, %s526_s9   ;;  %p754_p7 = scmp.ne.s32.totalorder %s749_s24, 0 }
  0xce   : > { %p755_p13 = scmp.ge.s32.totalorder %s546_s14, 2  ;;  %s258_s4 = scalar_lea.sflag [#allocation4], %s257_s30 }
  0xd0   : > { %p378_p3 = pnand %p755_p13, %p754_p7 }
  0xd2   : > { %521 = dma.done.wait (!%p378_p3), %s258_s4, 128  }
  0xd3   : > { %523 = vsyncadd (!%p378_p3), %s258_s4, 4294967168  ;;  %s18_s14 = sadd.s32 1, %s546_s14   ;;  %s756_s9 = smov %s530_s10 }
  0xd4   : > { %p15_p6 = scmp.ge.s32.totalorder %s18_s14, 4   ;;  %s757_s10 = smov %s534_s11 }
  0xd5   : > { %s758_s11 = smov %s623_s23  ;;  %s759_s12 = smov %s542_s13 }
  0xd6   : > { %s760_s13 = smov %s762_s17  ;;  %17 = sbr.rel (!%p15_p6) target bundleno = 6 (0x6), region = 76 }
  0xdd   :  { %263 = vsyncpa [#allocation3], 1 }
  0xde   :  { %265 = vsyncpa [#allocation3 + $0x1], 1 }
  0xdf   :  { %266 = vsyncpa [#allocation4], 1 }
  0xe0   :  { %268 = vsyncpa [#allocation4 + $0x1], 1 }

</bundles_post_ra>
